<compile_context>
chip_gen: v7x
topology: tpu7x:2x2x1
jax: 0.10.0
libtpu: 0.0.40
codegen_flags: <defaults>
</compile_context>

<pallas_src>
import functools

import jax
import jax.numpy as jnp
from jax import lax
from jax.experimental import pallas as pl
from jax.experimental.pallas import tpu as pltpu


_VMEM_BUDGET = 20 * 1024 * 1024   # working-set target (conservative for v7x)
_VMEM_LIMIT = 32 * 1024 * 1024    # explicit scoped-VMEM limit for both calls


# ------------------------------ tile pickers --------------------------------


def _pick_spatial_tile(P, ch, budget_bytes=_VMEM_BUDGET):
    """Largest multiple-of-128 divisor of P whose double-buffered tiles fit."""
    bytes_per_col = 2 * (ch + 3 * ch) * 4      # x tile + qkv tile, double-buffered, f32
    cap = max(1, budget_bytes // bytes_per_col)
    best = None
    t = 128
    while t <= min(P, cap):
        if P % t == 0:
            best = t
        t += 128
    if best is not None:
        return best
    return P                                   # full extent is always a legal block


def _pick_group_tile(ch, A, B, budget_bytes=_VMEM_BUDGET):
    """Largest divisor of ch (slices per grid step) fitting the VMEM budget."""
    S = max(A, B)
    per_slice = (2 * (3 * A * B + A * B) + 3 * S * S) * 4   # qkv+out dbl-buf + att scratch
    cap = max(1, budget_bytes // per_slice)
    gb = min(ch, cap)
    while ch % gb != 0:
        gb -= 1
    return gb


# ------------------------------ kernels --------------------------------------


def _qkv_proj_kernel(w_ref, b_ref, x_ref, o_ref):
    # w: (3C, C)  b: (3C, 1)  x: (1, C, TP)  o: (1, 3C, TP)
    # 1x1 conv in NCHW layout: qkv[:, p] = W @ x[:, p] + b  (MXU matmul).
    o_ref[0] = (
        jnp.dot(w_ref[...], x_ref[0], preferred_element_type=jnp.float32)
        + b_ref[...]
    ).astype(o_ref.dtype)


def _axis_att_kernel(qkv_ref, o_ref, *, gamma, axis):
    # qkv_ref: (1, 3, Gb, A, B) with A = h, B = w (always NCHW-sliced).
    # o_ref  : (1, Gb, A, B)    -> final (bs, ch, h, w) layout, no post-transpose.
    q = qkv_ref[0, 0]   # (Gb, A, B)
    k = qkv_ref[0, 1]
    v = qkv_ref[0, 2]

    if axis == "x":
        # att[g, i, j] = sum_a q[g, a, i] * k[g, a, j]      (attend along w)
        att = lax.dot_general(
            q, k, (((1,), (1,)), ((0,), (0,))),
            preferred_element_type=jnp.float32)
    else:  # axis == "y"
        # att[g, i, j] = sum_c q[g, i, c] * k[g, j, c]      (attend along h)
        att = lax.dot_general(
            q, k, (((2,), (2,)), ((0,), (0,))),
            preferred_element_type=jnp.float32)

    att = att * gamma
    att = att - jnp.max(att, axis=-1, keepdims=True)
    e = jnp.exp(att)
    att = e / jnp.sum(e, axis=-1, keepdims=True)
    # att_drop has p = 0.0 -> identity.

    if axis == "x":
        # out[g, a, j] = sum_i v[g, a, i] * att[g, i, j]
        out = lax.dot_general(
            v, att, (((2,), (1,)), ((0,), (0,))),
            preferred_element_type=jnp.float32)
    else:
        # out[g, j, c] = sum_i att[g, i, j] * v[g, i, c]   (== (V^T @ att)^T)
        out = lax.dot_general(
            att, v, (((1,), (1,)), ((0,), (0,))),
            preferred_element_type=jnp.float32)

    o_ref[0] = out.astype(o_ref.dtype)


# ------------------------------ wrapper --------------------------------------


def axis_attention_forward(x, w_qkv, b_qkv, *, num_head=4, axis="x"):
    """AxisAttention forward (pos_embed=False, dropout=0).

    x      : (bs, ch, h, w) float32, NCHW
    w_qkv  : (3*ch, ch, 1, 1) float32 (PyTorch Conv2d weight layout)
    b_qkv  : (3*ch,) float32
    """
    if axis not in ("x", "y"):
        raise ValueError("Unknown mode axis")
    bs, ch, h, w = x.shape
    assert ch % num_head == 0
    head_dim = ch // num_head
    gamma = float(head_dim) ** (-0.5)

    P = h * w
    C3 = 3 * ch

    # ---- 1x1 conv (qkv projection), NCHW-native, tiled over the spatial axis ----
    x3 = x.reshape(bs, ch, P)                                  # metadata reshape only
    w_mat = w_qkv.reshape(C3, ch).astype(jnp.float32)          # (3C, C)
    b_mat = b_qkv.reshape(C3, 1).astype(jnp.float32)           # (3C, 1)

    TP = _pick_spatial_tile(P, ch)
    qkv_cost = pl.CostEstimate(
        flops=2 * bs * P * ch * C3,
        transcendentals=0,
        bytes_accessed=4 * (bs * ch * P + bs * C3 * P + C3 * ch + C3),
    )
    qkv = pl.pallas_call(
        _qkv_proj_kernel,
        out_shape=jax.ShapeDtypeStruct((bs, C3, P), jnp.float32),
        grid=(bs, P // TP),
        in_specs=[
            pl.BlockSpec((C3, ch), lambda b, t: (0, 0)),       # weight stays resident
            pl.BlockSpec((C3, 1), lambda b, t: (0, 0)),        # bias stays resident
            pl.BlockSpec((1, ch, TP), lambda b, t: (b, 0, t)),
        ],
        out_specs=pl.BlockSpec((1, C3, TP), lambda b, t: (b, 0, t)),
        compiler_params=pltpu.CompilerParams(
            dimension_semantics=("parallel", "parallel"),
            vmem_limit_bytes=_VMEM_LIMIT,
        ),
        cost_estimate=qkv_cost,
    )(w_mat, b_mat, x3)

    # ---- axis attention: batched (b, head, head_dim) slices per grid step ------
    qkv5 = qkv.reshape(bs, 3, ch, h, w)                        # metadata reshape only
    Gb = _pick_group_tile(ch, h, w)
    S = w if axis == "x" else h                                # softmax length
    att_cost = pl.CostEstimate(
        flops=4 * bs * ch * h * w * S,
        transcendentals=bs * ch * S * S,
        bytes_accessed=4 * (bs * 3 * ch * h * w + bs * ch * h * w),
    )
    net = pl.pallas_call(
        functools.partial(_axis_att_kernel, gamma=gamma, axis=axis),
        out_shape=jax.ShapeDtypeStruct((bs, ch, h, w), jnp.float32),
        grid=(bs, ch // Gb),
        in_specs=[
            pl.BlockSpec((1, 3, Gb, h, w), lambda b, t: (b, 0, t, 0, 0)),
        ],
        out_specs=pl.BlockSpec((1, Gb, h, w), lambda b, t: (b, t, 0, 0)),
        compiler_params=pltpu.CompilerParams(
            dimension_semantics=("parallel", "parallel"),
            vmem_limit_bytes=_VMEM_LIMIT,
        ),
        cost_estimate=att_cost,
    )(qkv5)

    return net                                                 # already (bs, ch, h, w)


# ------------------------------ reference ------------------------------------


def axis_attention_reference(x, w_qkv, b_qkv, *, num_head=4, axis="x"):
    bs, ch, h, w = x.shape
    hd = ch // num_head
    gamma = float(hd) ** (-0.5)
    qkv = jnp.einsum("bchw,oc->bohw", x, w_qkv.reshape(3 * ch, ch))
    qkv = qkv + b_qkv[None, :, None, None]
    qkv = qkv.reshape(bs, 3, num_head, hd, h, w)
    if axis == "y":
        qkv = jnp.transpose(qkv, (0, 1, 2, 3, 5, 4))
    q, k, v = qkv[:, 0], qkv[:, 1], qkv[:, 2]
    att = jnp.einsum("bndai,bndaj->bndij", q, k)
    att = jax.nn.softmax(att * gamma, axis=-1)
    net = jnp.einsum("bndai,bndij->bndaj", v, att)
    if axis == "y":
        net = jnp.swapaxes(net, -2, -1)
    return net.reshape(bs, ch, h, w)


# ------------------------------ main ------------------------------------------


if __name__ == "__main__":
    bs, dim, h, w = 2, 8, 16, 16
    num_head = 4

    key = jax.random.PRNGKey(0)
    kx, kw, kb = jax.random.split(key, 3)
    x = jax.random.normal(kx, (bs, dim, h, w), dtype=jnp.float32)
    w_qkv = 0.1 * jax.random.normal(kw, (3 * dim, dim, 1, 1), dtype=jnp.float32)
    b_qkv = 0.1 * jax.random.normal(kb, (3 * dim,), dtype=jnp.float32)

    out_x = jax.block_until_ready(
        axis_attention_forward(x, w_qkv, b_qkv, num_head=num_head, axis="x")
    )
    out_y = jax.block_until_ready(
        axis_attention_forward(x, w_qkv, b_qkv, num_head=num_head, axis="y")
    )

    ref_x = axis_attention_reference(x, w_qkv, b_qkv, num_head=num_head, axis="x")
    ref_y = axis_attention_reference(x, w_qkv, b_qkv, num_head=num_head, axis="y")

    assert out_x.shape == (bs, dim, h, w)
    assert jnp.allclose(out_x, ref_x, atol=1e-4, rtol=1e-4)
    assert jnp.allclose(out_y, ref_y, atol=1e-4, rtol=1e-4)

    print("KERNEL_OK")
</pallas_src>

<mosaic_0001>
module attributes {stable_mosaic.version = 11 : i64} {
  func.func @_qkv_proj_kernel(%arg0: i32, %arg1: i32, %arg2: memref<24x8xf32, #tpu.memory_space<vmem>>, %arg3: memref<24x1xf32, #tpu.memory_space<vmem>>, %arg4: memref<1x8x256xf32, #tpu.memory_space<vmem>>, %arg5: memref<1x24x256xf32, #tpu.memory_space<vmem>>) attributes {dimension_semantics = [#tpu.dimension_semantics<parallel>, #tpu.dimension_semantics<parallel>], iteration_bounds = array<i64: 2, 1>, scalar_prefetch = 0 : i64, scratch_operands = 0 : i64, tpu.core_type = #tpu.core_type<tc>, window_params = [{pipeline_mode = #tpu.pipeline_mode<synchronous>, transform_indices = @transform_0, window_bounds = array<i64: 24, 8>}, {pipeline_mode = #tpu.pipeline_mode<synchronous>, transform_indices = @transform_1, window_bounds = array<i64: 24, 1>}, {transform_indices = @transform_2, window_bounds = array<i64: 1, 8, 256>}, {transform_indices = @transform_3, window_bounds = array<i64: 1, 24, 256>}]} {
    %c0 = arith.constant 0 : index
    %c0_0 = arith.constant 0 : index
    %0 = vector.load %arg2[%c0, %c0_0] : memref<24x8xf32, #tpu.memory_space<vmem>>, vector<24x8xf32>
    %c0_1 = arith.constant 0 : index
    %c0_2 = arith.constant 0 : index
    %c0_3 = arith.constant 0 : index
    %1 = vector.load %arg4[%c0_1, %c0_2, %c0_3] : memref<1x8x256xf32, #tpu.memory_space<vmem>>, vector<1x8x256xf32>
    %2 = vector.shape_cast %1 : vector<1x8x256xf32> to vector<8x256xf32>
    %cst = arith.constant dense<0.000000e+00> : vector<24x256xf32>
    %3 = tpu.matmul %0, %2, %cst {dimension_numbers = #tpu.dot_dimension_numbers<[1], [0], [0], [1], [0, 0, 1, 1], [], []>} : vector<24x8xf32>, vector<8x256xf32>, vector<24x256xf32> -> vector<24x256xf32>
    %c0_4 = arith.constant 0 : index
    %c0_5 = arith.constant 0 : index
    %4 = vector.load %arg3[%c0_4, %c0_5] : memref<24x1xf32, #tpu.memory_space<vmem>>, vector<24x1xf32>
    %5 = vector.broadcast %4 : vector<24x1xf32> to vector<24x256xf32>
    %6 = arith.addf %3, %5 : vector<24x256xf32>
    %c0_6 = arith.constant 0 : index
    %c0_7 = arith.constant 0 : index
    %c0_8 = arith.constant 0 : index
    %7 = vector.load %arg5[%c0_6, %c0_7, %c0_8] : memref<1x24x256xf32, #tpu.memory_space<vmem>>, vector<1x24x256xf32>
    %8 = vector.shape_cast %7 : vector<1x24x256xf32> to vector<24x256xf32>
    %9 = vector.shape_cast %6 : vector<24x256xf32> to vector<1x24x256xf32>
    tpu.vector_store %arg5[%c0_6, %c0_7, %c0_8], %9 {strides = array<i32>} : memref<1x24x256xf32, #tpu.memory_space<vmem>>, vector<1x24x256xf32>,
    return
  }
  func.func @transform_0(%arg0: i32, %arg1: i32) -> (i32, i32) {
    %c0_i32 = arith.constant 0 : i32
    %c0_i32_0 = arith.constant 0 : i32
    %c0_i32_1 = arith.constant 0 : i32
    return %c0_i32, %c0_i32_0 : i32, i32
  }
  func.func @transform_1(%arg0: i32, %arg1: i32) -> (i32, i32) {
    %c0_i32 = arith.constant 0 : i32
    %c0_i32_0 = arith.constant 0 : i32
    %c0_i32_1 = arith.constant 0 : i32
    return %c0_i32, %c0_i32_0 : i32, i32
  }
  func.func @transform_2(%arg0: i32, %arg1: i32) -> (i32, i32, i32) {
    %c0_i32 = arith.constant 0 : i32
    %c0_i32_0 = arith.constant 0 : i32
    return %arg0, %c0_i32, %arg1 : i32, i32, i32
  }
  func.func @transform_3(%arg0: i32, %arg1: i32) -> (i32, i32, i32) {
    %c0_i32 = arith.constant 0 : i32
    %c0_i32_0 = arith.constant 0 : i32
    return %arg0, %c0_i32, %arg1 : i32, i32, i32
  }
}

</mosaic_0001>

<bundles_post_ra>
// kernel: tpu_custom_call.1
= control target key start
LH: loop header
LB: loop body
LE: loop exit
PB: predicated region body
PF: predicated region fallthrough
CT: control target
= control target key end

     0   :  { %8 = vsyncpa [#allocation3], 0  ;;  %s734_s0 = inlined_call_operand.vmem [shape: f32[24,8], index: 0, kind: input, shape index: {}]   ;;  %s735_s1 = inlined_call_operand.vmem [shape: f32[24,1], index: 1, kind: input, shape index: {}]   ;;  %s736_s2 = inlined_call_operand.vmem [shape: f32[2,8,256], index: 2, kind: input, shape index: {}]   ;;  %s737_s3 = inlined_call_operand.hbm [shape: f32[2,24,256], index: 3, kind: output, shape index: {}]  }
   0x1   :  { %10 = vsyncpa [#allocation3 + $0x1], 0  ;;  %s601_s12 = smov 0   ;;  %s603_s13 = smov 0  }
   0x2   :  { %s605_s14 = smov 0   ;;  %s607_s15 = smov 0  }
   0x3   :  { %s609_s16 = smov 0   ;;  %s611_s17 = smov 0  }
   0x4 LB: > { %s417_s18 = sadd.s32 4294967295, %s574_s17   ;;  %s418_s19 = sadd.s32 4294967294, %s574_s17   ;;  %s574_s17 = sphi %s611_s17, %s16_s17   ;;  %s570_s16 = sphi %s609_s16, %s744_s16   ;;  %s566_s15 = sphi %s607_s15, %s743_s15   ;;  %s562_s14 = sphi %s605_s14, %s742_s14   ;;  %s558_s13 = sphi %s603_s13, %s741_s13   ;;  %s554_s12 = sphi %s601_s12, %s740_s12  }
   0x5   : > { %s28_s20 = sadd.s32 1, %s570_s16  ;;  %s107_s21 = sadd.s32 1, %s562_s14 }
   0x6   : > { %p30_p0 = scmp.ge.s32.totalorder %s28_s20, 2  ;;  %p117_p1 = scmp.ne.s32.totalorder %s562_s14, %s558_s13 }
   0x7   : > { %p118_p2 = scmp.eq.s32.totalorder %s417_s18, 1  ;;  %p123_p3 = scmp.ne.s32.totalorder %s558_s13, %s554_s12 }
   0x8   : > { %s746_s20 = smov (%p30_p0, %s28_s20), 0  ;;  %p124_p5 = scmp.eq.s32.totalorder %s418_s19, 1 }
   0x9   : > { %p641_p4 = por %p118_p2, %p117_p1  ;;  %s102_s23 = ssub.s32 %s570_s16, %s746_s20 }
   0xa   : > { %p421_p6 = scmp.ge.s32.totalorder %s574_s17, 1  ;;  %p105_p7 = scmp.eq.s32.totalorder %s102_s23, 0 }
   0xb   : > { %p648_p8 = por %p124_p5, %p123_p3  ;;  %p161_p9 = scmp.lt.s32.totalorder %s574_s17, 3 }
   0xc   : > { %s654_s25 = scalar_select %p105_p7, %s562_s14, %s107_s21  }
   0xd   : > { %p162_p10 = pnand %p421_p6, %p161_p9 }
   0xe   : > { %p190_p11 = scmp.lt.s32.totalorder (!%p162_p10), %s566_s15, 1  ;;  %v576_v0 = vmov (!%p162_p10), 0.0   ;;  %v205_v1 = vld [vmem:[%s735_s1] sm:$0xff] (!%p162_p10)  ;;  %v207_v2 = vld [vmem:[%s735_s1 + $0x10] sm:$0xff] (!%p162_p10)  ;;  %v577_v3 = vmov (!%p162_p10), 0   ;;  %vm223_vm0 = vcmask (!%p162_p10), 64512  }
   0xf   : > { %165 = sbr.rel (%p162_p10) target bundleno = 263 (0x107), region = 32  ;;  %297 = vmatprep.mubr.f32.mxu0 (!%p162_p10), %v576_v0  ;;  %303 = vmatprep.mubr.f32.mxu1 (!%p162_p10), %v576_v0  ;;  %v200_v4 = vld [vmem:[%s734_s0] sm:$0xff] (!%p162_p10)  ;;  %v201_v7 = vld [vmem:[%s734_s0 + $0x8] sm:$0xff] (!%p162_p10)  ;;  %v202_v9 = vld [vmem:[%s734_s0 + $0x10] sm:$0xff] (!%p162_p10)  ;;  %s186_s26 = sand.u32 (!%p162_p10), 1, %s558_s13  }
  0x10   : > { %494 = vset.pattern.permute.xlu0 (!%p162_p10), %v577_v3  ;;  %495 = vset.pattern.permute.xlu1 (!%p162_p10), %v577_v3  ;;  %v206_v8 = vld [vmem:[%s735_s1 + $0x8] sm:$0xff] (!%p162_p10)  ;;  %s433_s27 = smul.u32 (!%p162_p10), 48, %s186_s26  ;;  %s688_s6 = scalar_lea.sflag (!%p162_p10), [#allocation3], %s186_s26 }
  0x11   : > { %210 = vperm.xlu0 (!%p162_p10), %494, %v205_v1   ;;  %220 = vperm.xlu1 (!%p162_p10), %495, %v207_v2   ;;  %s434_s28 = smul.u32 (!%p162_p10), 768, %s566_s15  ;;  %s578_s8 = smov (!%p162_p10), [#allocation2]  }
  0x12   : > { %s188_s29 = scalar_lea.vmem (!%p162_p10), [#allocation2], %s433_s27  ;;  %s500_s9 = sshll.u32 (!%p162_p10), %s578_s8, 4  ;;  %s501_s9 = int_to_ptr.vmem [resolvable:$false] %s500_s9 }
  0x13   : > { %s686_s5 = scalar_lea.hbm (!%p162_p10), %s737_s3, %s434_s28  ;;  %s502_s10 = scalar_lea.vmem (!%p162_p10), %s501_s9, 1536 }
  0x15   : > { %215 = vperm.xlu0 (!%p162_p10), %494, %v206_v8  }
  0x16   : > { %s191_s30 = scalar_select %p190_p11, %s566_s15, 1 }
  0x18   : > { %s430_s4 = sshll.u32 %s191_s30, 4  ;;  %s338_s30 = sshll.u32 %s188_s29, 4  ;;  %s681_s30 = int_to_ptr.vmem [resolvable:$true] %s338_s30 }
  0x19   : > { %s197_s7 = scalar_lea.vmem %s736_s2, %s430_s4  ;;  %p503_p1 = scmp.lt.s32.totalorder %s681_s30, %s501_s9 }
  0x1a   : > { %v204_v5 = vld [vmem:[%s197_s7 + $0x8] sm:$0xff]  ;;  %v203_v6 = vld [vmem:[%s197_s7] sm:$0xff]  ;;  %s496_s7 = scalar_lea.vmem %s681_s30, 768 }
  0x1b   : > { %233 = vmatprep.subr.mxu0 %v204_v5  ;;  %431 = vmatprep.subr.mxu1 %v204_v5  ;;  %p497_p12 = scmp.ne.s32.totalorder %s681_s30, %s496_s7  ;;  %p504_p2 = scmp.lt.s32.totalorder %s502_s10, %s496_s7 }
  0x1c   : > { %234 = vmatpush1.msra.mxu0 %v203_v6  ;;  %432 = vmatpush1.msra.mxu1 %v203_v6 }
  0x1d   : > { %424 = vmatmul.mubr.msk.f32.vlgmr.msra.gmra.mrb[0].mxu0 %vm223_vm0, %v200_v4  ;;  %425 = vmatmul.mubr.msk.f32.vlgmr.msra.gmra.mrb[0].mxu1 %vm223_vm0, %v201_v7  ;;  %p498_p13 = pnand %p497_p12, %p641_p4  ;;  %p505_p3 = por %p504_p2, %p503_p1 }
  0x1e   : > { %309 = vmatprep.mubr.f32.mxu1 %v576_v0 }
  0x1f   : > { %p499_p0 = pneg %p498_p13 }
  0x21   : > { %426 = vmatmul.mubr.msk.f32.gmra.mrb[2].mxu1 %vm223_vm0, %v202_v9  ;;  %p506_p5 = pnand %p505_p3, %p499_p0 }
  0x90   : > { %v211_v10 = vpop.permute.xlu0 %210  ;;  %v221_v20 = vpop.permute.xlu1 %220 }
  0x94   : > { %v216_v11 = vpop.permute.xlu0 %215 }
  0xf0   : > { %v299_v12 = vpop.f32.mrb[0].mxu0  ;;  %v305_v13 = vpop.f32.mrb[0].mxu1 }
  0xf1   : > { %v300_v14 = vadd.f32 %v299_v12, %v211_v10  ;;  %v306_v15 = vadd.f32 %v305_v13, %v216_v11  ;;  %v301_v16 = vpop.f32.mrb[1].mxu0  ;;  %v307_v17 = vpop.f32.mrb[1].mxu1 }
  0xf2   : > { %v302_v18 = vadd.f32 %v301_v16, %v211_v10  ;;  %v308_v19 = vadd.f32 %v307_v17, %v216_v11 }
  0xf3   : > { %316 = vst [vmem:[%s188_s29] sm:$0xff] %v300_v14  ;;  %318 = vst [vmem:[%s188_s29 + $0x10] sm:$0xff] %v306_v15 }
  0xf4   : > { %317 = vst [vmem:[%s188_s29 + $0x8] sm:$0xff] %v302_v18  ;;  %319 = vst [vmem:[%s188_s29 + $0x18] sm:$0xff] %v308_v19  ;;  %v311_v21 = vpop.f32.mrb[2].mxu1 }
  0xf5   : > { %v312_v22 = vadd.f32 %v311_v21, %v221_v20  ;;  %v313_v23 = vpop.f32.mrb[3].mxu1 }
  0xf6   : > { %v314_v24 = vadd.f32 %v313_v23, %v221_v20 }
  0xf7   : > { %320 = vst [vmem:[%s188_s29 + $0x20] sm:$0xff] %v312_v22 }
  0xf8   : > { %321 = vst [vmem:[%s188_s29 + $0x28] sm:$0xff] %v314_v24 }
  0xf9   : > { %509 = shalt.err (!%p506_p5)
}
  0xfa   : > { %s510_s11 = scalar_lea.hbm %s686_s5, 768  ;;  %s514_s21 = scalar_lea.hbm %s737_s3, 1536 }
  0xfb   : > { %p511_p6 = scmp.ne.s32.totalorder %s686_s5, %s510_s11  ;;  %p515_p10 = scmp.lt.u32.totalorder %s686_s5, %s737_s3 }
  0xfc   : > { %p516_p11 = scmp.lt.u32.totalorder %s514_s21, %s510_s11  ;;  %p518_p13 = scmp.lt.u32.totalorder %s510_s11, %s686_s5 }
  0xfd   : > { %p512_p7 = pnand %p511_p6, %p641_p4 }
  0xfe   : > { %p517_p12 = por %p516_p11, %p515_p10 }
  0xff   : > { %p513_p9 = pneg %p512_p7 }
 0x100   : > { %p519_p0 = por %p518_p13, %p517_p12 }
 0x102   : > { %p520_p1 = pnand %p519_p0, %p513_p9 }
 0x104   : > { %523 = shalt.err (!%p520_p1)
}
 0x105   : > { %s579_s27 = smov 256   ;;  %s580_s28 = smov 16  }
 0x106   : > { %435 = dma.vmem_to_hbm [thread:$0]  (%p641_p4), %s681_s30, 768, %s686_s5, %s688_s6, %s579_s27, %s579_s27, %s580_s28  }
 0x107 PF: > { %p441_p2 = scmp.ge.s32.totalorder %s574_s17, 2  ;;  %s353_s29 = sand.u32 1, %s554_s12  }
 0x108   : > { %s354_s4 = scalar_lea.sflag [#allocation3], %s353_s29 }
 0x109   : > { %p438_p3 = pnand %p441_p2, %p648_p8 }
 0x10b   : > { %549 = dma.done.wait (!%p438_p3), %s354_s4, 768  }
 0x10c   : > { %551 = vsyncadd (!%p438_p3), %s354_s4, 4294966528  ;;  %s16_s17 = sadd.s32 1, %s574_s17   ;;  %s740_s12 = smov %s558_s13 }
 0x10d   : > { %p13_p5 = scmp.ge.s32.totalorder %s16_s17, 4   ;;  %s741_s13 = smov %s562_s14 }
 0x10e   : > { %s742_s14 = smov %s654_s25  ;;  %s743_s15 = smov %s570_s16 }
 0x10f   : > { %s744_s16 = smov %s746_s20  ;;  %15 = sbr.rel (!%p13_p5) target bundleno = 4 (0x4), region = 67 }
 0x116   :  { %359 = vsyncpa [#allocation3], 1 }
 0x117   :  { %361 = vsyncpa [#allocation3 + $0x1], 1 }

</bundles_post_ra>
